<compile_context>
chip_gen: v5e
topology: v5e:2x2
jax: 0.10.0
libtpu: 0.0.40
codegen_flags: <defaults>
</compile_context>

<pallas_src>
import jax
import jax.numpy as jnp
from jax.experimental import pallas as pl
from jax.experimental.pallas import tpu as pltpu


def _make_loss_kernel(inv_b: float):
    """Build the kernel with 1/B baked in as a compile-time constant."""

    def _loss_kernel(spk_ref, dts_ref, dtq_ref, dss_ref, dsq_ref, logits_ref, out_ref):
        step = pl.program_id(0)

        # ---- init the SMEM accumulator on the first row tile -----------------
        @pl.when(step == 0)
        def _init():
            out_ref[0] = jnp.float32(0.0)   # total
            out_ref[1] = jnp.float32(0.0)   # D_s
            out_ref[2] = jnp.float32(0.0)   # D_t
            out_ref[3] = jnp.float32(0.0)   # cls

        # ---- MSE terms (mean == sum * 1/B; no padding, no masks) -------------
        dts = dts_ref[...]                   # (tb, 1) f32
        dtq = dtq_ref[...]
        dss = dss_ref[...]
        dsq = dsq_ref[...]
        d_t_part = (jnp.sum((dts - 1.0) ** 2) + jnp.sum(dtq * dtq)) * inv_b
        d_s_part = (jnp.sum((dss - 1.0) ** 2) + jnp.sum(dsq * dsq)) * inv_b

        # ---- Cross-entropy term (no full logp / one-hot materialization) -----
        logits = logits_ref[...]                                    # (tb, C) f32
        m = jnp.max(logits, axis=-1, keepdims=True)
        shifted = logits - m
        lse = jnp.log(jnp.sum(jnp.exp(shifted), axis=-1, keepdims=True))  # (tb, 1)
        labels = spk_ref[...]                                       # (tb, 1) int32
        ccol = jax.lax.broadcasted_iota(jnp.int32, logits.shape, 1)
        picked = jnp.sum(jnp.where(ccol == labels, shifted, 0.0))   # sum_i shifted[i, label_i]
        cls_part = (jnp.sum(lse) - picked) * inv_b

        # ---- accumulate partials ---------------------------------------------
        out_ref[1] += d_s_part
        out_ref[2] += d_t_part
        out_ref[3] += cls_part

        # ---- finalize on the last row tile ------------------------------------
        @pl.when(step == pl.num_programs(0) - 1)
        def _finalize():
            out_ref[0] = out_ref[1] + out_ref[2] + out_ref[3]

    return _loss_kernel


def _choose_row_tile(b: int, c: int) -> int:
    """Pick a row tile: multiple of 8 dividing B, sized so double-buffered
    (tb, C) f32 stays comfortably inside scoped VMEM on all generations."""
    if b % 8 != 0:
        return b  # full-array block (exempt from the (8,128) rule)
    bytes_per_row = 4 * (c + 8)                      # logits row + scores/labels
    cap = (4 * 1024 * 1024) // bytes_per_row // 8 * 8
    cap = max(8, min(512, cap))
    tb = min(b, cap)
    while b % tb:
        tb -= 8
    return tb


@jax.jit
def meta_stylespeech_loss_disc(speakers, predictions):
    """Returns (total_loss, D_s_loss, D_t_loss, cls_loss) as f32 scalars."""
    D_t_s, D_t_q, D_s_s, D_s_q, style_logit = predictions
    logits = jnp.asarray(style_logit, jnp.float32)
    B, C = logits.shape
    inv_b = 1.0 / float(B)

    # Cheap metadata-only reshapes; no pads, no stacks, no extra HBM passes.
    scores = [jnp.asarray(x, jnp.float32).reshape(B, 1)
              for x in (D_t_s, D_t_q, D_s_s, D_s_q)]
    spk = jnp.asarray(speakers, jnp.int32).reshape(B, 1)

    tb = _choose_row_tile(B, C)
    grid = (B // tb,)

    col_spec = pl.BlockSpec((tb, 1), lambda i: (i, 0))      # scores / labels
    logit_spec = pl.BlockSpec((tb, C), lambda i: (i, 0))    # full class dim per tile
    out_spec = pl.BlockSpec(memory_space=pltpu.MemorySpace.SMEM)

    cost = pl.CostEstimate(
        flops=B * (12 + 5 * C),
        transcendentals=B * (C + 1),
        bytes_accessed=4 * (5 * B + B * C) + 16,
    )

    out = pl.pallas_call(
        _make_loss_kernel(inv_b),
        out_shape=jax.ShapeDtypeStruct((4,), jnp.float32),
        grid=grid,
        in_specs=[col_spec, col_spec, col_spec, col_spec, col_spec, logit_spec],
        out_specs=out_spec,
        compiler_params=pltpu.CompilerParams(dimension_semantics=("arbitrary",)),
        cost_estimate=cost,
    )(spk, *scores, logits)

    return out[0], out[1], out[2], out[3]


def _reference(speakers, predictions):
    D_t_s, D_t_q, D_s_s, D_s_q, style_logit = [jnp.asarray(x, jnp.float32) for x in predictions]
    d_t = jnp.mean((D_t_s - 1.0) ** 2) + jnp.mean(D_t_q ** 2)
    d_s = jnp.mean((D_s_s - 1.0) ** 2) + jnp.mean(D_s_q ** 2)
    logp = jax.nn.log_softmax(style_logit, axis=-1)
    cls = -jnp.mean(jnp.take_along_axis(logp, speakers[:, None].astype(jnp.int32), axis=-1))
    return d_t + d_s + cls, d_s, d_t, cls


if __name__ == "__main__":
    key = jax.random.PRNGKey(0)
    B, C = 8, 32
    k1, k2, k3, k4, k5, k6 = jax.random.split(key, 6)

    D_t_s = jax.random.normal(k1, (B,), jnp.float32)
    D_t_q = jax.random.normal(k2, (B,), jnp.float32)
    D_s_s = jax.random.normal(k3, (B,), jnp.float32)
    D_s_q = jax.random.normal(k4, (B,), jnp.float32)
    style_logit = jax.random.normal(k5, (B, C), jnp.float32)
    speakers = jax.random.randint(k6, (B,), 0, C, jnp.int32)

    predictions = (D_t_s, D_t_q, D_s_s, D_s_q, style_logit)

    total, d_s, d_t, cls = meta_stylespeech_loss_disc(speakers, predictions)
    jax.block_until_ready(total)

    ref = _reference(speakers, predictions)
    for got, want in zip((total, d_s, d_t, cls), ref):
        assert jnp.allclose(got, want, rtol=1e-3, atol=1e-3), (got, want)

    print("KERNEL_OK")
</pallas_src>

<mosaic_0001>
module attributes {stable_mosaic.version = 11 : i64} {
  func.func @_loss_kernel(%arg0: i32, %arg1: memref<8x1xi32, #tpu.memory_space<vmem>>, %arg2: memref<8x1xf32, #tpu.memory_space<vmem>>, %arg3: memref<8x1xf32, #tpu.memory_space<vmem>>, %arg4: memref<8x1xf32, #tpu.memory_space<vmem>>, %arg5: memref<8x1xf32, #tpu.memory_space<vmem>>, %arg6: memref<8x32xf32, #tpu.memory_space<vmem>>, %arg7: memref<4xf32, #tpu.memory_space<smem>>) attributes {dimension_semantics = [#tpu.dimension_semantics<arbitrary>], iteration_bounds = array<i64: 1>, scalar_prefetch = 0 : i64, scratch_operands = 0 : i64, tpu.core_type = #tpu.core_type<tc>, window_params = [{transform_indices = @transform_0, window_bounds = array<i64: 8, 1>}, {transform_indices = @transform_1, window_bounds = array<i64: 8, 1>}, {transform_indices = @transform_2, window_bounds = array<i64: 8, 1>}, {transform_indices = @transform_3, window_bounds = array<i64: 8, 1>}, {transform_indices = @transform_4, window_bounds = array<i64: 8, 1>}, {transform_indices = @transform_5, window_bounds = array<i64: 8, 32>}, {transform_indices = @transform_6, window_bounds = array<i64: 4>}]} {
    %c0_i32 = arith.constant 0 : i32
    %0 = arith.cmpi eq, %arg0, %c0_i32 : i32
    %1 = arith.extui %0 : i1 to i32
    %c0_i32_0 = arith.constant 0 : i32
    %2 = arith.cmpi ne, %1, %c0_i32_0 : i32
    scf.if %2 {
      %cst_30 = arith.constant 0.000000e+00 : f32
      %c0_31 = arith.constant 0 : index
      %72 = memref.load %arg7[%c0_31] : memref<4xf32, #tpu.memory_space<smem>>
      memref.store %cst_30, %arg7[%c0_31] : memref<4xf32, #tpu.memory_space<smem>>
      %cst_32 = arith.constant 0.000000e+00 : f32
      %c1_33 = arith.constant 1 : index
      %73 = memref.load %arg7[%c1_33] : memref<4xf32, #tpu.memory_space<smem>>
      memref.store %cst_32, %arg7[%c1_33] : memref<4xf32, #tpu.memory_space<smem>>
      %cst_34 = arith.constant 0.000000e+00 : f32
      %c2_35 = arith.constant 2 : index
      %74 = memref.load %arg7[%c2_35] : memref<4xf32, #tpu.memory_space<smem>>
      memref.store %cst_34, %arg7[%c2_35] : memref<4xf32, #tpu.memory_space<smem>>
      %cst_36 = arith.constant 0.000000e+00 : f32
      %c3_37 = arith.constant 3 : index
      %75 = memref.load %arg7[%c3_37] : memref<4xf32, #tpu.memory_space<smem>>
      memref.store %cst_36, %arg7[%c3_37] : memref<4xf32, #tpu.memory_space<smem>>
    } else {
    }
    %c0 = arith.constant 0 : index
    %c0_1 = arith.constant 0 : index
    %3 = vector.load %arg2[%c0, %c0_1] : memref<8x1xf32, #tpu.memory_space<vmem>>, vector<8x1xf32>
    %c0_2 = arith.constant 0 : index
    %c0_3 = arith.constant 0 : index
    %4 = vector.load %arg3[%c0_2, %c0_3] : memref<8x1xf32, #tpu.memory_space<vmem>>, vector<8x1xf32>
    %c0_4 = arith.constant 0 : index
    %c0_5 = arith.constant 0 : index
    %5 = vector.load %arg4[%c0_4, %c0_5] : memref<8x1xf32, #tpu.memory_space<vmem>>, vector<8x1xf32>
    %c0_6 = arith.constant 0 : index
    %c0_7 = arith.constant 0 : index
    %6 = vector.load %arg5[%c0_6, %c0_7] : memref<8x1xf32, #tpu.memory_space<vmem>>, vector<8x1xf32>
    %cst = arith.constant 1.000000e+00 : f32
    %7 = vector.broadcast %cst : f32 to vector<8x1xf32>
    %8 = arith.subf %3, %7 : vector<8x1xf32>
    %9 = arith.mulf %8, %8 : vector<8x1xf32>
    %10 = vector.shape_cast %9 : vector<8x1xf32> to vector<1x8x1xf32>
    %cst_8 = arith.constant dense<0.000000e+00> : vector<1xf32>
    %11 = vector.multi_reduction <add>, %10, %cst_8 [1, 2] : vector<1x8x1xf32> to vector<1xf32>
    %12 = vector.shape_cast %11 : vector<1xf32> to vector<1x1x1xf32>
    %13 = vector.extract %12[0, 0, 0] : f32 from vector<1x1x1xf32>
    %14 = arith.mulf %4, %4 : vector<8x1xf32>
    %15 = vector.shape_cast %14 : vector<8x1xf32> to vector<1x8x1xf32>
    %cst_9 = arith.constant dense<0.000000e+00> : vector<1xf32>
    %16 = vector.multi_reduction <add>, %15, %cst_9 [1, 2] : vector<1x8x1xf32> to vector<1xf32>
    %17 = vector.shape_cast %16 : vector<1xf32> to vector<1x1x1xf32>
    %18 = vector.extract %17[0, 0, 0] : f32 from vector<1x1x1xf32>
    %19 = arith.addf %13, %18 : f32
    %cst_10 = arith.constant 1.250000e-01 : f32
    %20 = arith.mulf %19, %cst_10 : f32
    %cst_11 = arith.constant 1.000000e+00 : f32
    %21 = vector.broadcast %cst_11 : f32 to vector<8x1xf32>
    %22 = arith.subf %5, %21 : vector<8x1xf32>
    %23 = arith.mulf %22, %22 : vector<8x1xf32>
    %24 = vector.shape_cast %23 : vector<8x1xf32> to vector<1x8x1xf32>
    %cst_12 = arith.constant dense<0.000000e+00> : vector<1xf32>
    %25 = vector.multi_reduction <add>, %24, %cst_12 [1, 2] : vector<1x8x1xf32> to vector<1xf32>
    %26 = vector.shape_cast %25 : vector<1xf32> to vector<1x1x1xf32>
    %27 = vector.extract %26[0, 0, 0] : f32 from vector<1x1x1xf32>
    %28 = arith.mulf %6, %6 : vector<8x1xf32>
    %29 = vector.shape_cast %28 : vector<8x1xf32> to vector<1x8x1xf32>
    %cst_13 = arith.constant dense<0.000000e+00> : vector<1xf32>
    %30 = vector.multi_reduction <add>, %29, %cst_13 [1, 2] : vector<1x8x1xf32> to vector<1xf32>
    %31 = vector.shape_cast %30 : vector<1xf32> to vector<1x1x1xf32>
    %32 = vector.extract %31[0, 0, 0] : f32 from vector<1x1x1xf32>
    %33 = arith.addf %27, %32 : f32
    %cst_14 = arith.constant 1.250000e-01 : f32
    %34 = arith.mulf %33, %cst_14 : f32
    %c0_15 = arith.constant 0 : index
    %c0_16 = arith.constant 0 : index
    %35 = vector.load %arg6[%c0_15, %c0_16] : memref<8x32xf32, #tpu.memory_space<vmem>>, vector<8x32xf32>
    %cst_17 = arith.constant dense<0xFF800000> : vector<8xf32>
    %36 = vector.multi_reduction <maximumf>, %35, %cst_17 [1] : vector<8x32xf32> to vector<8xf32>
    %37 = vector.shape_cast %36 : vector<8xf32> to vector<8x1xf32>
    %38 = vector.broadcast %37 : vector<8x1xf32> to vector<8x32xf32>
    %39 = arith.subf %35, %38 : vector<8x32xf32>
    %40 = math.exp %39 : vector<8x32xf32>
    %cst_18 = arith.constant dense<0.000000e+00> : vector<8xf32>
    %41 = vector.multi_reduction <add>, %40, %cst_18 [1] : vector<8x32xf32> to vector<8xf32>
    %42 = vector.shape_cast %41 : vector<8xf32> to vector<8x1xf32>
    %43 = math.log %42 : vector<8x1xf32>
    %c0_19 = arith.constant 0 : index
    %c0_20 = arith.constant 0 : index
    %44 = vector.load %arg1[%c0_19, %c0_20] : memref<8x1xi32, #tpu.memory_space<vmem>>, vector<8x1xi32>
    %45 = tpu.iota {dimensions = array<i32: 1>} : vector<8x32xi32>
    %46 = vector.broadcast %44 : vector<8x1xi32> to vector<8x32xi32>
    %47 = arith.cmpi eq, %45, %46 : vector<8x32xi32>
    %cst_21 = arith.constant 0.000000e+00 : f32
    %48 = vector.broadcast %cst_21 : f32 to vector<8x32xf32>
    %49 = arith.select %47, %39, %48 : vector<8x32xi1>, vector<8x32xf32>
    %50 = vector.shape_cast %49 : vector<8x32xf32> to vector<1x8x32xf32>
    %cst_22 = arith.constant dense<0.000000e+00> : vector<1xf32>
    %51 = vector.multi_reduction <add>, %50, %cst_22 [1, 2] : vector<1x8x32xf32> to vector<1xf32>
    %52 = vector.shape_cast %51 : vector<1xf32> to vector<1x1x1xf32>
    %53 = vector.extract %52[0, 0, 0] : f32 from vector<1x1x1xf32>
    %54 = vector.shape_cast %43 : vector<8x1xf32> to vector<1x8x1xf32>
    %cst_23 = arith.constant dense<0.000000e+00> : vector<1xf32>
    %55 = vector.multi_reduction <add>, %54, %cst_23 [1, 2] : vector<1x8x1xf32> to vector<1xf32>
    %56 = vector.shape_cast %55 : vector<1xf32> to vector<1x1x1xf32>
    %57 = vector.extract %56[0, 0, 0] : f32 from vector<1x1x1xf32>
    %58 = arith.subf %57, %53 : f32
    %cst_24 = arith.constant 1.250000e-01 : f32
    %59 = arith.mulf %58, %cst_24 : f32
    %c1 = arith.constant 1 : index
    %60 = memref.load %arg7[%c1] : memref<4xf32, #tpu.memory_space<smem>>
    %61 = arith.addf %60, %34 : f32
    %c1_25 = arith.constant 1 : index
    %62 = memref.load %arg7[%c1_25] : memref<4xf32, #tpu.memory_space<smem>>
    memref.store %61, %arg7[%c1_25] : memref<4xf32, #tpu.memory_space<smem>>
    %c2 = arith.constant 2 : index
    %63 = memref.load %arg7[%c2] : memref<4xf32, #tpu.memory_space<smem>>
    %64 = arith.addf %63, %20 : f32
    %c2_26 = arith.constant 2 : index
    %65 = memref.load %arg7[%c2_26] : memref<4xf32, #tpu.memory_space<smem>>
    memref.store %64, %arg7[%c2_26] : memref<4xf32, #tpu.memory_space<smem>>
    %c3 = arith.constant 3 : index
    %66 = memref.load %arg7[%c3] : memref<4xf32, #tpu.memory_space<smem>>
    %67 = arith.addf %66, %59 : f32
    %c3_27 = arith.constant 3 : index
    %68 = memref.load %arg7[%c3_27] : memref<4xf32, #tpu.memory_space<smem>>
    memref.store %67, %arg7[%c3_27] : memref<4xf32, #tpu.memory_space<smem>>
    %c0_i32_28 = arith.constant 0 : i32
    %69 = arith.cmpi eq, %arg0, %c0_i32_28 : i32
    %70 = arith.extui %69 : i1 to i32
    %c0_i32_29 = arith.constant 0 : i32
    %71 = arith.cmpi ne, %70, %c0_i32_29 : i32
    scf.if %71 {
      %c1_30 = arith.constant 1 : index
      %72 = memref.load %arg7[%c1_30] : memref<4xf32, #tpu.memory_space<smem>>
      %c2_31 = arith.constant 2 : index
      %73 = memref.load %arg7[%c2_31] : memref<4xf32, #tpu.memory_space<smem>>
      %74 = arith.addf %72, %73 : f32
      %c3_32 = arith.constant 3 : index
      %75 = memref.load %arg7[%c3_32] : memref<4xf32, #tpu.memory_space<smem>>
      %76 = arith.addf %74, %75 : f32
      %c0_33 = arith.constant 0 : index
      %77 = memref.load %arg7[%c0_33] : memref<4xf32, #tpu.memory_space<smem>>
      memref.store %76, %arg7[%c0_33] : memref<4xf32, #tpu.memory_space<smem>>
    } else {
    }
    return
  }
  func.func @transform_0(%arg0: i32) -> (i32, i32) {
    %c0_i32 = arith.constant 0 : i32
    %c0_i32_0 = arith.constant 0 : i32
    return %arg0, %c0_i32 : i32, i32
  }
  func.func @transform_1(%arg0: i32) -> (i32, i32) {
    %c0_i32 = arith.constant 0 : i32
    %c0_i32_0 = arith.constant 0 : i32
    return %arg0, %c0_i32 : i32, i32
  }
  func.func @transform_2(%arg0: i32) -> (i32, i32) {
    %c0_i32 = arith.constant 0 : i32
    %c0_i32_0 = arith.constant 0 : i32
    return %arg0, %c0_i32 : i32, i32
  }
  func.func @transform_3(%arg0: i32) -> (i32, i32) {
    %c0_i32 = arith.constant 0 : i32
    %c0_i32_0 = arith.constant 0 : i32
    return %arg0, %c0_i32 : i32, i32
  }
  func.func @transform_4(%arg0: i32) -> (i32, i32) {
    %c0_i32 = arith.constant 0 : i32
    %c0_i32_0 = arith.constant 0 : i32
    return %arg0, %c0_i32 : i32, i32
  }
  func.func @transform_5(%arg0: i32) -> (i32, i32) {
    %c0_i32 = arith.constant 0 : i32
    %c0_i32_0 = arith.constant 0 : i32
    return %arg0, %c0_i32 : i32, i32
  }
  func.func @transform_6(%arg0: i32) -> i32 {
    %c0_i32 = arith.constant 0 : i32
    %c0_i32_0 = arith.constant 0 : i32
    return %c0_i32 : i32
  }
}

</mosaic_0001>

<bundles_post_ra>
// kernel: meta_stylespeech_loss_disc.1
= control target key start
LH: loop header
LB: loop body
LE: loop exit
PB: predicated region body
PF: predicated region fallthrough
CT: control target
= control target key end

     0   :  { %vm92_vm0 = vcmask 261120   ;;  %vm42_vm1 = vcmask 7168   ;;  %v214_v4 = vmov 0   ;;  %s280_s0 = inlined_call_operand.vmem [shape: s32[8,1], index: 0, kind: input, shape index: {}]   ;;  %s281_s1 = inlined_call_operand.vmem [shape: f32[8,1], index: 1, kind: input, shape index: {}]   ;;  %s282_s2 = inlined_call_operand.vmem [shape: f32[8,1], index: 2, kind: input, shape index: {}]   ;;  %s283_s3 = inlined_call_operand.vmem [shape: f32[8,1], index: 3, kind: input, shape index: {}]   ;;  %s284_s4 = inlined_call_operand.vmem [shape: f32[8,1], index: 4, kind: input, shape index: {}]   ;;  %s285_s5 = inlined_call_operand.vmem [shape: f32[8,32], index: 5, kind: input, shape index: {}]   ;;  %s286_s6 = inlined_call_operand.vmem [shape: f32[4], index: 6, kind: output, shape index: {}]  }
   0x1   :  { %v91_v0 = vld [vmem:[%s285_s5] sm:$0xff]  ;;  %194 = vset.pattern.permute.xlu1 %v214_v4  ;;  %195 = vset.pattern.permute.xlu0 %v214_v4 }
   0x2   :  { %v104_v1 = vld [vmem:[%s280_s0] sm:$0xff]  ;;  %v93_v3 = vsel %vm92_vm0, %v91_v0, -inf }
   0x3   :  { %v37_v2 = vld [vmem:[%s282_s2] sm:$0xff] }
   0x4   :  { %v53_v5 = vmul.f32 %v37_v2, %v37_v2  ;;  %v38_v6 = vld [vmem:[%s283_s3] sm:$0xff] }
   0x5   :  { %11 = vsyncpa [#allocation3], 0  ;;  %94 = vmax.xlane.f32.xlu0 %v93_v3  ;;  %108 = vperm.xlu1 %194, %v104_v1   ;;  %v172_v7 = vadd.f32 -1.0, %v38_v6  ;;  %v36_v11 = vld [vmem:[%s281_s1] sm:$0xff]  ;;  %v105_v15 = vlaneseq  ;;  %s161_s18 = sshll.u32 %s286_s6, 4  ;;  %s215_s20 = smov [#allocation2]   ;;  %s162_s18 = int_to_ptr.vmem [resolvable:$true] %s161_s18 }
   0x6   :  { %v54_v8 = vsel %vm42_vm1, %v53_v5, 0.0  ;;  %v171_v12 = vadd.f32 -1.0, %v36_v11  ;;  %v39_v24 = vld [vmem:[%s284_s4] sm:$0xff] }
   0x7   :  { %55 = vadd.xlane.f32.xlu2 %v54_v8  ;;  %v67_v9 = vmul.f32 %v172_v7, %v172_v7  ;;  %v106_v16 = vand.u32 127, %v105_v15  ;;  %v78_v26 = vmul.f32 %v39_v24, %v39_v24 }
   0x8   :  { %v41_v13 = vmul.f32 %v171_v12, %v171_v12 }
   0x9   :  { %v68_v10 = vsel %vm42_vm1, %v67_v9, 0.0  ;;  %v79_v27 = vsel %vm42_vm1, %v78_v26, 0.0 }
   0xa   :  { %v43_v14 = vsel %vm42_vm1, %v41_v13, 0.0 }
   0xf   :  { %69 = vadd.xlane.f32.xlu2 %v68_v10 }
  0x2f   :  { %44 = vadd.xlane.f32.xlu1 %v43_v14 }
  0x77   :  { %v109_v17 = vpop.permute.xlu1 %108 }
  0x78   :  { %v95_v18 = vpop.xlane.xlu0 %94  ;;  %vm110_vm2 = vcmp.eq.s32.totalorder %v106_v16, %v109_v17 }
  0x79   :  { %v96_v19 = vsub.f32 %v91_v0, %v95_v18 }
  0x7a   :  { %v56_v28 = vpop.xlane.xlu2 %55 }
  0x7b   :  { %v97_v20 = vmul.f32 1.442695, %v96_v19  ;;  %v111_v21 = vsel %vm110_vm2, %v96_v19, 0.0  ;;  %v57_v30 = vrot.slane %v56_v28, 4 }
  0x7c   :  { %v112_v22 = vsel %vm92_vm0, %v111_v21, 0.0 }
  0x7d   :  { %196 = vpow2.f32 %v97_v20  ;;  %113 = vadd.xlane.f32.xlu2 %v112_v22  ;;  %v58_v32 = vadd.f32 %v57_v30, %v56_v28 }
  0x7f   :  { %v59_v35 = vrot.slane %v58_v32, 2 }
  0x81   :  { %v60_v40 = vadd.f32 %v59_v35, %v58_v32 }
  0x82   :  { %v70_v29 = vpop.xlane.xlu2 %69 }
  0x83   :  { %v197_v23 = vpop.eup %196  ;;  %v71_v31 = vrot.slane %v70_v29, 4  ;;  %v61_v43 = vrot.slane %v60_v40, 1 }
  0x84   :  { %v99_v25 = vsel %vm92_vm0, %v197_v23, 0.0 }
  0x85   :  { %100 = vadd.xlane.f32.xlu0 %v99_v25  ;;  %v72_v33 = vadd.f32 %v71_v31, %v70_v29  ;;  %v62_v46 = vadd.f32 %v61_v43, %v60_v40 }
  0x87   :  { %v73_v36 = vrot.slane %v72_v33, 2 }
  0x89   :  { %v74_v41 = vadd.f32 %v73_v36, %v72_v33 }
  0x8b   :  { %v75_v44 = vrot.slane %v74_v41, 1 }
  0x8d   :  { %80 = vadd.xlane.f32.xlu0 %v79_v27  ;;  %v76_v48 = vadd.f32 %v75_v44, %v74_v41 }
  0xa2   :  { %v45_v34 = vpop.xlane.xlu1 %44 }
  0xa3   :  { %v46_v37 = vrot.slane %v45_v34, 4 }
  0xa5   :  { %v47_v38 = vadd.f32 %v46_v37, %v45_v34 }
  0xa7   :  { %v48_v39 = vrot.slane %v47_v38, 2 }
  0xa9   :  { %v49_v42 = vadd.f32 %v48_v39, %v47_v38 }
  0xab   :  { %v50_v45 = vrot.slane %v49_v42, 1 }
  0xad   :  { %v51_v47 = vadd.f32 %v50_v45, %v49_v42 }
  0xaf   :  { %179 = vpush %v51_v47 }
  0xb0   :  { %181 = vpush %v62_v46 }
  0xb1   :  { %183 = vpush %v76_v48 }
  0xe0   :  { %s180_s4 = spop %179 }
  0xe1   :  { %s182_s5 = spop %181 }
  0xe2   :  { %s64_s29 = sadd.f32 %s182_s5, %s180_s4  ;;  %s184_s7 = spop %183 }
  0xe4   :  { %s65_s30 = smul.f32 0.125, %s64_s29 }
  0xe6   :  { %141 = sst [smem:[#allocation2 + $0x2]] %s65_s30 }
  0xf0   :  { %v114_v49 = vpop.xlane.xlu2 %113 }
  0xf1   :  { %v115_v50 = vrot.slane %v114_v49, 4 }
  0xf3   :  { %v116_v52 = vadd.f32 %v115_v50, %v114_v49 }
  0xf5   :  { %v117_v54 = vrot.slane %v116_v52, 2 }
  0xf7   :  { %v118_v60 = vadd.f32 %v117_v54, %v116_v52 }
  0xf8   :  { %v101_v51 = vpop.xlane.xlu0 %100 }
  0xf9   :  { %198 = vlog2.f32 %v101_v51  ;;  %v119_v63 = vrot.slane %v118_v60, 1 }
  0xfb   :  { %v120_v2 = vadd.f32 %v119_v63, %v118_v60 }
  0xff   :  { %v199_v53 = vpop.eup %198 }
 0x100   :  { %v103_v55 = vmul.f32 0.6931472, %v199_v53  ;;  %v81_v56 = vpop.xlane.xlu0 %80 }
 0x101   :  { %v82_v57 = vrot.slane %v81_v56, 4 }
 0x102   :  { %v122_v58 = vsel %vm42_vm1, %v103_v55, 0.0 }
 0x103   :  { %v83_v59 = vadd.f32 %v82_v57, %v81_v56  ;;  %123 = vadd.xlane.f32.xlu0 %v122_v58 }
 0x105   :  { %v84_v61 = vrot.slane %v83_v59, 2 }
 0x107   :  { %v85_v62 = vadd.f32 %v84_v61, %v83_v59 }
 0x109   :  { %v86_v0 = vrot.slane %v85_v62, 1 }
 0x10b   :  { %v87_v1 = vadd.f32 %v86_v0, %v85_v62 }
 0x10d   :  { %185 = vpush %v87_v1 }
 0x10e   :  { %187 = vpush %v120_v2 }
 0x13e   :  { %s186_s8 = spop %185 }
 0x13f   :  { %s89_s9 = sadd.f32 %s186_s8, %s184_s7  ;;  %s188_s12 = spop %187 }
 0x141   :  { %s90_s10 = smul.f32 0.125, %s89_s9 }
 0x143   :  { %137 = sst [smem:[#allocation2 + $0x1]] %s90_s10 }
 0x144   :  { %s151_s11 = sadd.f32 %s90_s10, %s65_s30 }
 0x176   :  { %v124_v3 = vpop.xlane.xlu0 %123 }
 0x177   :  { %v125_v4 = vrot.slane %v124_v3, 4 }
 0x179   :  { %v126_v5 = vadd.f32 %v125_v4, %v124_v3 }
 0x17b   :  { %v127_v6 = vrot.slane %v126_v5, 2 }
 0x17d   :  { %v128_v7 = vadd.f32 %v127_v6, %v126_v5 }
 0x17f   :  { %v129_v8 = vrot.slane %v128_v7, 1 }
 0x181   :  { %v130_v9 = vadd.f32 %v129_v8, %v128_v7 }
 0x183   :  { %189 = vpush %v130_v9 }
 0x1b4   :  { %s190_s13 = spop %189 }
 0x1b5   :  { %s132_s14 = ssub.f32 %s190_s13, %s188_s12 }
 0x1b7   :  { %s133_s15 = smul.f32 0.125, %s132_s14 }
 0x1b9   :  { %145 = sst [smem:[#allocation2 + $0x3]] %s133_s15 }
 0x1ba   :  { %s153_s19 = sadd.f32 %s151_s11, %s133_s15 }
 0x1bc   :  { %155 = sst [smem:[#allocation2]] %s153_s19 }
 0x1bd   :  { %164 = dma.smem_to_vmem %s215_s20, 16, %s162_s18, [#allocation3]  }
 0x1be   :  { %212 = dma.done.wait [#allocation3], 16  }
 0x1bf   :  { %213 = vsyncadd [#allocation3], 4294967280 }
 0x1c0   :  { %169 = sfence }
 0x1c1   :  { %170 = vsyncpa [#allocation3], 1 }

</bundles_post_ra>
